<compile_context>
chip_gen: v7x
topology: tpu7x:2x2x1
jax: 0.10.0
libtpu: 0.0.40
codegen_flags: <defaults>
</compile_context>

<pallas_src>
import functools

import jax
import jax.numpy as jnp
from jax.experimental import pallas as pl
from jax.experimental.pallas import tpu as pltpu


def _round_up(x, m):
    return (x + m - 1) // m * m


def _linear_kernel(x_ref, w_ref, b_ref, o_ref, acc_ref):
    # x_ref: (tm, tk) bf16   w_ref: (tk, tn) bf16   b_ref: (1, tn) f32
    # o_ref: (tm, tn) out dtype   acc_ref: (tm, tn) f32, resident across K axis.
    k = pl.program_id(2)

    @pl.when(k == 0)
    def _():
        acc_ref[...] = jnp.zeros_like(acc_ref)

    acc_ref[...] += jnp.dot(
        x_ref[...], w_ref[...], preferred_element_type=jnp.float32
    )

    @pl.when(k == pl.num_programs(2) - 1)
    def _():
        # Bias add in f32, cast back once in the epilogue (not re-done per K step).
        o_ref[...] = (acc_ref[...] + b_ref[...]).astype(o_ref.dtype)


@functools.partial(jax.jit, static_argnames=("tm", "tn", "tk"))
def pallas_linear(x2d, w, b, *, tm=None, tn=None, tk=None):
    """y = x2d @ w + b via a tiled, lane-dense, weight-resident Pallas kernel."""
    M, K = x2d.shape
    Kw, N = w.shape
    assert K == Kw, (K, Kw)

    # Lane-dense padding: last dims become multiples of 128.
    K_pad = _round_up(K, 128)
    N_pad = _round_up(N, 128)

    # Tiles: tm multiple of 16 (bf16 sublane packing), tn/tk multiples of 128.
    # Capped at 512 so 2x double-buffered bf16 inputs + f32 acc + out tile stay
    # well under v5e's 16 MiB default scoped VMEM (and v7x's 64 MiB physical).
    if tm is None:
        tm = min(512, _round_up(M, 16))
    if tn is None:
        tn = min(512, N_pad)
    if tk is None:
        tk = min(512, K_pad)
    M_pad = _round_up(M, tm)

    # Pad + cast: bf16 operands for the MXU, bias stays f32 for the epilogue.
    x_p = jnp.zeros((M_pad, K_pad), jnp.bfloat16).at[:M, :K].set(
        x2d.astype(jnp.bfloat16))
    w_p = jnp.zeros((K_pad, N_pad), jnp.bfloat16).at[:K, :N].set(
        w.astype(jnp.bfloat16))
    b_p = jnp.zeros((1, N_pad), jnp.float32).at[0, :N].set(
        b.astype(jnp.float32))

    grid = (M_pad // tm, N_pad // tn, K_pad // tk)

    out = pl.pallas_call(
        _linear_kernel,
        out_shape=jax.ShapeDtypeStruct((M_pad, N_pad), x2d.dtype),
        grid=grid,
        in_specs=[
            pl.BlockSpec((tm, tk), lambda i, j, k: (i, k)),
            # W block index independent of i: weight tile stays VMEM-resident
            # while the row axis sweeps.
            pl.BlockSpec((tk, tn), lambda i, j, k: (k, j)),
            pl.BlockSpec((1, tn), lambda i, j, k: (0, j)),
        ],
        out_specs=pl.BlockSpec((tm, tn), lambda i, j, k: (i, j)),
        scratch_shapes=[pltpu.VMEM((tm, tn), jnp.float32)],
        compiler_params=pltpu.CompilerParams(
            dimension_semantics=("parallel", "parallel", "arbitrary"),
        ),
    )(x_p, w_p, b_p)

    return out[:M, :N]


class InnerLinearModule:
    """Deterministic stand-in for the wrapped nn.Module: Linear(hidden, hidden)."""

    def __init__(self, hidden, key):
        kw, kb = jax.random.split(key)
        bound = 1.0 / jnp.sqrt(jnp.float32(hidden))
        # Stored already transposed to (in, out) so the kernel computes x @ W.
        self.w = jax.random.uniform(kw, (hidden, hidden), jnp.float32, -bound, bound)
        self.b = jax.random.uniform(kb, (hidden,), jnp.float32, -bound, bound)
        self.hidden = hidden

    def __call__(self, x):
        lead = x.shape[:-1]
        x2d = x.reshape(-1, self.hidden)
        y2d = pallas_linear(x2d, self.w, self.b)
        return y2d.reshape(*lead, self.hidden)


class WrappedModel:
    """Faithful port of the PyTorch WrappedModel: forward(x) = module(x)."""

    def __init__(self, module):
        self.module = module

    def __call__(self, x):
        return self.module(x)


if __name__ == "__main__":
    key = jax.random.PRNGKey(0)
    k_in, k_mod = jax.random.split(key)

    batch, seq, hidden = 2, 8, 32
    x = jax.random.normal(k_in, (batch, seq, hidden), jnp.float32)

    inner = InnerLinearModule(hidden, k_mod)
    model = WrappedModel(inner)

    y = model(x)
    jax.block_until_ready(y)

    # Reference with the same bf16 operand rounding + f32 accumulation + f32 bias.
    x_bf = x.reshape(-1, hidden).astype(jnp.bfloat16)
    w_bf = inner.w.astype(jnp.bfloat16)
    y_ref = jnp.dot(x_bf, w_bf, preferred_element_type=jnp.float32) + inner.b
    y_ref = y_ref.astype(x.dtype).reshape(batch, seq, hidden)
    assert jnp.allclose(y, y_ref, atol=1e-3, rtol=1e-3), float(
        jnp.max(jnp.abs(y - y_ref)))

    print("KERNEL_OK")
</pallas_src>

<mosaic_0001>
module attributes {stable_mosaic.version = 11 : i64} {
  func.func @_linear_kernel(%arg0: i32, %arg1: i32, %arg2: i32, %arg3: memref<16x128xbf16, #tpu.memory_space<vmem>>, %arg4: memref<128x128xbf16, #tpu.memory_space<vmem>>, %arg5: memref<1x128xf32, #tpu.memory_space<vmem>>, %arg6: memref<16x128xf32, #tpu.memory_space<vmem>>, %arg7: memref<16x128xf32, #tpu.memory_space<vmem>>) attributes {dimension_semantics = [#tpu.dimension_semantics<parallel>, #tpu.dimension_semantics<parallel>, #tpu.dimension_semantics<arbitrary>], iteration_bounds = array<i64: 1, 1, 1>, scalar_prefetch = 0 : i64, scratch_operands = 1 : i64, tpu.core_type = #tpu.core_type<tc>, window_params = [{transform_indices = @transform_0, window_bounds = array<i64: 16, 128>}, {transform_indices = @transform_1, window_bounds = array<i64: 128, 128>}, {transform_indices = @transform_2, window_bounds = array<i64: 1, 128>}, {transform_indices = @transform_3, window_bounds = array<i64: 16, 128>}]} {
    %c0_i32 = arith.constant 0 : i32
    %0 = arith.cmpi eq, %arg2, %c0_i32 : i32
    %1 = arith.extui %0 : i1 to i32
    %c0_i32_0 = arith.constant 0 : i32
    %2 = arith.cmpi ne, %1, %c0_i32_0 : i32
    scf.if %2 {
      %cst_10 = arith.constant 0.000000e+00 : f32
      %12 = vector.broadcast %cst_10 : f32 to vector<16x128xf32>
      %c0_11 = arith.constant 0 : index
      %c0_12 = arith.constant 0 : index
      %13 = vector.load %arg7[%c0_11, %c0_12] : memref<16x128xf32, #tpu.memory_space<vmem>>, vector<16x128xf32>
      tpu.vector_store %arg7[%c0_11, %c0_12], %12 {strides = array<i32>} : memref<16x128xf32, #tpu.memory_space<vmem>>, vector<16x128xf32>,
    } else {
    }
    %c0 = arith.constant 0 : index
    %c0_1 = arith.constant 0 : index
    %3 = vector.load %arg7[%c0, %c0_1] : memref<16x128xf32, #tpu.memory_space<vmem>>, vector<16x128xf32>
    %c0_2 = arith.constant 0 : index
    %c0_3 = arith.constant 0 : index
    %4 = vector.load %arg3[%c0_2, %c0_3] : memref<16x128xbf16, #tpu.memory_space<vmem>>, vector<16x128xbf16>
    %c0_4 = arith.constant 0 : index
    %c0_5 = arith.constant 0 : index
    %5 = vector.load %arg4[%c0_4, %c0_5] : memref<128x128xbf16, #tpu.memory_space<vmem>>, vector<128x128xbf16>
    %cst = arith.constant dense<0.000000e+00> : vector<16x128xf32>
    %6 = tpu.matmul %4, %5, %cst {dimension_numbers = #tpu.dot_dimension_numbers<[1], [0], [0], [1], [0, 0, 1, 1], [], []>} : vector<16x128xbf16>, vector<128x128xbf16>, vector<16x128xf32> -> vector<16x128xf32>
    %7 = arith.addf %3, %6 : vector<16x128xf32>
    %c0_6 = arith.constant 0 : index
    %c0_7 = arith.constant 0 : index
    %8 = vector.load %arg7[%c0_6, %c0_7] : memref<16x128xf32, #tpu.memory_space<vmem>>, vector<16x128xf32>
    tpu.vector_store %arg7[%c0_6, %c0_7], %7 {strides = array<i32>} : memref<16x128xf32, #tpu.memory_space<vmem>>, vector<16x128xf32>,
    %c0_i32_8 = arith.constant 0 : i32
    %9 = arith.cmpi eq, %arg2, %c0_i32_8 : i32
    %10 = arith.extui %9 : i1 to i32
    %c0_i32_9 = arith.constant 0 : i32
    %11 = arith.cmpi ne, %10, %c0_i32_9 : i32
    scf.if %11 {
      %c0_10 = arith.constant 0 : index
      %c0_11 = arith.constant 0 : index
      %12 = vector.load %arg7[%c0_10, %c0_11] : memref<16x128xf32, #tpu.memory_space<vmem>>, vector<16x128xf32>
      %c0_12 = arith.constant 0 : index
      %c0_13 = arith.constant 0 : index
      %13 = vector.load %arg5[%c0_12, %c0_13] : memref<1x128xf32, #tpu.memory_space<vmem>>, vector<1x128xf32>
      %14 = vector.broadcast %13 : vector<1x128xf32> to vector<16x128xf32>
      %15 = arith.addf %12, %14 : vector<16x128xf32>
      %c0_14 = arith.constant 0 : index
      %c0_15 = arith.constant 0 : index
      %16 = vector.load %arg6[%c0_14, %c0_15] : memref<16x128xf32, #tpu.memory_space<vmem>>, vector<16x128xf32>
      tpu.vector_store %arg6[%c0_14, %c0_15], %15 {strides = array<i32>} : memref<16x128xf32, #tpu.memory_space<vmem>>, vector<16x128xf32>,
    } else {
    }
    return
  }
  func.func @transform_0(%arg0: i32, %arg1: i32, %arg2: i32) -> (i32, i32) {
    %c0_i32 = arith.constant 0 : i32
    return %arg0, %arg2 : i32, i32
  }
  func.func @transform_1(%arg0: i32, %arg1: i32, %arg2: i32) -> (i32, i32) {
    %c0_i32 = arith.constant 0 : i32
    return %arg2, %arg1 : i32, i32
  }
  func.func @transform_2(%arg0: i32, %arg1: i32, %arg2: i32) -> (i32, i32) {
    %c0_i32 = arith.constant 0 : i32
    %c0_i32_0 = arith.constant 0 : i32
    return %c0_i32, %arg1 : i32, i32
  }
  func.func @transform_3(%arg0: i32, %arg1: i32, %arg2: i32) -> (i32, i32) {
    %c0_i32 = arith.constant 0 : i32
    return %arg0, %arg1 : i32, i32
  }
}

</mosaic_0001>

<bundles_post_ra>
// kernel: pallas_linear.1
= control target key start
LH: loop header
LB: loop body
LE: loop exit
PB: predicated region body
PF: predicated region fallthrough
CT: control target
= control target key end

     0   :  { %v250_v1 = vmov 0.0   ;;  %vm251_vm0 = vmmov 0   ;;  %s317_s0 = inlined_call_operand.vmem [shape: bf16[16,128], index: 0, kind: input, shape index: {}]   ;;  %s318_s1 = inlined_call_operand.vmem [shape: bf16[128,128], index: 1, kind: input, shape index: {}]   ;;  %s319_s2 = inlined_call_operand.vmem [shape: f32[1,128], index: 2, kind: input, shape index: {}]   ;;  %s320_s3 = inlined_call_operand.hbm [shape: f32[16,128], index: 3, kind: output, shape index: {}]  }
   0x1   :  { %v217_v0 = vld [vmem:[%s318_s1] sm:$0xff]   ;;  %192 = vmatprep.subr.bf16.mxu0 %v250_v1  ;;  %v218_v2 = vld [vmem:[%s318_s1 + $0x8] sm:$0xff]   ;;  %208 = vmatprep.mubr.msk.bf16.mxu0 %vm251_vm0, %v250_v1  ;;  %v219_v3 = vld [vmem:[%s318_s1 + $0x10] sm:$0xff]  }
   0x2   :  { %193 = vmatpush3.bf16.msra.mxu0 %v217_v0 }
   0x3   :  { %194 = vmatprep.subr.bf16.mxu0 %v250_v1 }
   0x6   :  { %195 = vmatpush3.bf16.msra.mxu0 %v218_v2 }
   0x7   :  { %196 = vmatprep.subr.bf16.mxu0 %v250_v1 }
   0x8   :  { %8 = vsyncpa [#allocation4], 0  ;;  %v220_v4 = vld [vmem:[%s318_s1 + $0x18] sm:$0xff]   ;;  %v221_v5 = vld [vmem:[%s318_s1 + $0x20] sm:$0xff]   ;;  %s252_s5 = smov [#allocation3]  }
   0x9   :  { %v222_v6 = vld [vmem:[%s318_s1 + $0x28] sm:$0xff]   ;;  %v223_v7 = vld [vmem:[%s318_s1 + $0x30] sm:$0xff]   ;;  %v224_v8 = vld [vmem:[%s318_s1 + $0x38] sm:$0xff]   ;;  %s162_s6 = sshll.u32 %s252_s5, 4  ;;  %s163_s6 = int_to_ptr.vmem [resolvable:$true] %s162_s6 }
   0xa   :  { %197 = vmatpush3.bf16.msra.mxu0 %v219_v3  ;;  %v225_v9 = vld [vmem:[%s317_s0] sm:$0xff]   ;;  %s226_s1 = scalar_lea.vmem %s163_s6, 256  ;;  %p231_p1 = scmp.lt.s32.totalorder %s163_s6, %s163_s6 }
   0xb   :  { %198 = vmatprep.subr.bf16.mxu0 %v250_v1  ;;  %v182_v10 = vld [vmem:[%s319_s2] ss:$0 sm:$0xff]  ;;  %p227_p0 = scmp.ne.s32.totalorder %s163_s6, %s226_s1  ;;  %p232_p2 = scmp.lt.s32.totalorder %s226_s1, %s226_s1 }
   0xd   :  { %p233_p3 = por %p232_p2, %p231_p1 }
   0xe   :  { %199 = vmatpush3.bf16.msra.mxu0 %v220_v4 }
   0xf   :  { %200 = vmatprep.subr.bf16.mxu0 %v250_v1  ;;  %p234_p4 = pnand %p233_p3, %p227_p0 }
  0x12   :  { %201 = vmatpush3.bf16.msra.mxu0 %v221_v5 }
  0x13   :  { %202 = vmatprep.subr.bf16.mxu0 %v250_v1 }
  0x16   :  { %203 = vmatpush3.bf16.msra.mxu0 %v222_v6 }
  0x17   :  { %204 = vmatprep.subr.bf16.mxu0 %v250_v1 }
  0x1a   :  { %205 = vmatpush3.bf16.msra.mxu0 %v223_v7 }
  0x1b   :  { %206 = vmatprep.subr.bf16.mxu0 %v250_v1 }
  0x1e   :  { %207 = vmatpush3.bf16.msra.mxu0 %v224_v8 }
  0x21   :  { %209 = vmatmul.mubr.bf16.vlgmr.msra.gmra.mrb[0].mxu0 %v225_v9 }
  0xf4   :  { %v130_v11 = vpop.f32.mrb[0].mxu0 }
  0xf5   :  { %v153_v12 = vadd.f32 %v182_v10, %v130_v11  ;;  %v210_v13 = vpop.f32.mrb[1].mxu0 }
  0xf6   :  { %v133_v14 = vpop.f32.mrb[2].mxu0 }
  0xf7   :  { %155 = vst [vmem:[#allocation3] sm:$0xff] %v153_v12  ;;  %v154_v15 = vadd.f32 %v182_v10, %v133_v14  ;;  %v211_v16 = vpop.f32.mrb[3].mxu0 }
  0xf9   :  { %156 = vst [vmem:[#allocation3 + $0x8] sm:$0xff] %v154_v15 }
  0xfa   :  { %237 = shalt.err (!%p234_p4)
}
  0xfb   :  { %s238_s7 = scalar_lea.hbm %s320_s3, 256 }
  0xfc   :  { %p239_p5 = scmp.ne.s32.totalorder %s320_s3, %s238_s7  ;;  %p242_p6 = scmp.lt.u32.totalorder %s238_s7, %s320_s3 }
  0xfe   :  { %p244_p7 = pnand %p242_p6, %p239_p5 }
 0x100   :  { %247 = shalt.err (!%p244_p7)
}
 0x101   :  { %s253_s12 = smov 128   ;;  %s254_s13 = smov 8  }
 0x102   :  { %168 = dma.vmem_to_hbm [thread:$0]  %s163_s6, 256, %s320_s3, [#allocation4], %s253_s12, %s253_s12, %s254_s13  }
 0x103   :  { %248 = dma.done.wait [#allocation4], 256  }
 0x104   :  { %249 = vsyncadd [#allocation4], 4294967040 }
 0x105   :  { %172 = vsyncpa [#allocation4], 1 }

</bundles_post_ra>
